<compile_context>
chip_gen: v7x
topology: tpu7x:2x2x1
jax: 0.10.0
libtpu: 0.0.40
codegen_flags: <defaults>
</compile_context>

<pallas_src>
import functools
import math

import jax
import jax.numpy as jnp
from jax.experimental import pallas as pl
from jax.experimental.pallas import tpu as pltpu


def _xlogx(v):
    return v * math.log(v) if v > 0.0 else 0.0


def _label_smoothing_kernel(x_ref, tgt_ref, out_ref, *, padding_idx,
                            confidence, smooth_val, c_row):
    """One (tile_n, V) block of rows; writes this block's partial loss."""
    x = x_ref[...].astype(jnp.float32)          # (tn, V) log-probs (upcast post-DMA)
    tgt = tgt_ref[...]                          # (tn, 1) int32 labels
    tn, V = x.shape

    col = jax.lax.broadcasted_iota(jnp.int32, (tn, V), 1)
    row_ok = tgt != padding_idx                              # (tn, 1) non-pad rows
    valid = jnp.logical_and(row_ok, col != padding_idx)      # drop pad col + pad rows

    td = jnp.where(col == tgt, confidence, smooth_val)
    # Select (not multiply-by-mask) so garbage/NaN rows in the boundary block of
    # x contribute exactly 0 (their targets are padding_idx -> row_ok False).
    prod = jnp.where(valid, td * x, 0.0)

    n_rows = jnp.sum(row_ok.astype(jnp.float32))
    # partial loss = n_nonpad_rows*C_row - sum(td*x) for this block
    out_ref[...] = jnp.reshape(n_rows * c_row - jnp.sum(prod), (1, 1, 1))


def label_smoothing_loss(x, target, *, size, padding_idx, smoothing,
                         block_budget_bytes=4 << 20, max_tile_rows=2048):
    """x: (N, V) log-probs (f32 or bf16); target: (N,) int. Returns scalar f32."""
    N, V = x.shape
    assert V == size
    assert size > 2, "smoothing/(size-2) requires size > 2"
    # TODO(synk): extremely large V (minimum 8-row block over ~48 MiB) would need
    # column tiling of the vocab axis; not needed for typical transformer vocabs.

    tgt = target.astype(jnp.int32).reshape(N, 1)
    if N < 8:
        # Tiny-input case: bring row count up to one sublane group (cheap copy).
        x = jnp.pad(x, ((0, 8 - N), (0, 0)))
        tgt = jnp.pad(tgt, ((0, 8 - N), (0, 0)), constant_values=padding_idx)
        N = 8

    # Row tile: as large as the per-block f32 budget allows, multiple of 8,
    # never larger than (N // 8) * 8 so the last block always overlaps x.
    budget_rows = block_budget_bytes // max(1, V * 4)
    cap_rows = (N // 8) * 8
    rows = max(8, min(int(budget_rows), max_tile_rows, cap_rows))
    tile_n = (rows // 8) * 8

    num_blocks = pl.cdiv(N, tile_n)
    padded_N = num_blocks * tile_n
    if padded_N != N:
        # Only the (N,1) int32 targets get padded; padded rows carry padding_idx
        # so the garbage tail of the boundary x block contributes exactly 0.
        tgt = jnp.pad(tgt, ((0, padded_N - N), (0, 0)),
                      constant_values=padding_idx)

    confidence = 1.0 - smoothing
    smooth_val = smoothing / (size - 2)
    # Per non-pad row: sum(td*log(td)) = (V-2)*sv*log(sv) + conf*log(conf)
    c_row = (size - 2) * _xlogx(smooth_val) + _xlogx(confidence)

    kernel = functools.partial(_label_smoothing_kernel,
                               padding_idx=padding_idx,
                               confidence=confidence,
                               smooth_val=smooth_val,
                               c_row=c_row)

    # Explicit VMEM limit: double-buffered x + target blocks, allowance for the
    # f32 elementwise intermediates (upcast, td, prod, iota/masks) + headroom;
    # capped well under v7x's 64 MiB physical VMEM.
    itemsize = jnp.dtype(x.dtype).itemsize
    x_block = tile_n * V * itemsize
    x_block_f32 = tile_n * V * 4
    vmem_needed = 2 * (x_block + tile_n * 4) + 5 * x_block_f32 + (1 << 20)
    vmem_limit = int(min(max(vmem_needed, 16 << 20), 48 << 20))

    partials = pl.pallas_call(
        kernel,
        out_shape=jax.ShapeDtypeStruct((num_blocks, 1, 1), jnp.float32),
        grid_spec=pltpu.PrefetchScalarGridSpec(
            num_scalar_prefetch=0,
            grid=(num_blocks,),
            in_specs=[
                pl.BlockSpec((tile_n, V), lambda i: (i, 0)),
                pl.BlockSpec((tile_n, 1), lambda i: (i, 0)),
            ],
            out_specs=pl.BlockSpec((1, 1, 1), lambda i: (i, 0, 0)),
        ),
        compiler_params=pltpu.CompilerParams(
            dimension_semantics=("parallel",),
            vmem_limit_bytes=vmem_limit,
        ),
    )(x, tgt)
    return jnp.sum(partials)


def _reference(x, target, *, size, padding_idx, smoothing):
    """Pure-JAX reference mirroring the PyTorch module."""
    confidence = 1.0 - smoothing
    smooth_val = smoothing / (size - 2)
    N, V = x.shape
    col = jnp.arange(V)[None, :]
    tgt = target[:, None]
    td = jnp.where(col == tgt, confidence, smooth_val)
    td = jnp.where(col == padding_idx, 0.0, td)
    td = jnp.where(tgt == padding_idx, 0.0, td)
    pos = td > 0.0
    log_td = jnp.log(jnp.where(pos, td, 1.0))
    return jnp.sum(jnp.where(pos, td * (log_td - x.astype(jnp.float32)), 0.0))


if __name__ == "__main__":
    SIZE = 32          # vocab size (x.shape[1] must equal this)
    PADDING_IDX = 0
    SMOOTHING = 0.1
    N = 19             # deliberately not a multiple of 8 to exercise the ragged tail

    key = jax.random.PRNGKey(0)
    k_logits, k_tgt = jax.random.split(key)

    # x is expected to be log-probabilities (KLDivLoss input convention).
    logits = jax.random.normal(k_logits, (N, SIZE), dtype=jnp.float32)
    x = jax.nn.log_softmax(logits, axis=-1)

    # Targets include some padding_idx rows to exercise the masking path.
    target = jax.random.randint(k_tgt, (N,), 0, SIZE, dtype=jnp.int32)
    target = target.at[3].set(PADDING_IDX)
    target = target.at[9].set(PADDING_IDX)

    loss = label_smoothing_loss(x, target, size=SIZE,
                                padding_idx=PADDING_IDX, smoothing=SMOOTHING)
    loss = jax.block_until_ready(loss)

    ref = _reference(x, target, size=SIZE,
                     padding_idx=PADDING_IDX, smoothing=SMOOTHING)
    assert jnp.allclose(loss, ref, rtol=1e-5, atol=1e-4), (loss, ref)

    print("KERNEL_OK")
</pallas_src>

<mosaic_0001>
module attributes {stable_mosaic.version = 11 : i64} {
  func.func @_label_smoothing_kernel(%arg0: i32, %arg1: memref<16x32xf32, #tpu.memory_space<vmem>>, %arg2: memref<16x1xi32, #tpu.memory_space<vmem>>, %arg3: memref<1x1x1xf32, #tpu.memory_space<vmem>>) attributes {dimension_semantics = [#tpu.dimension_semantics<parallel>], iteration_bounds = array<i64: 2>, scalar_prefetch = 0 : i64, scratch_operands = 0 : i64, tpu.core_type = #tpu.core_type<tc>, window_params = [{transform_indices = @transform_0, window_bounds = array<i64: 16, 32>}, {transform_indices = @transform_1, window_bounds = array<i64: 16, 1>}, {transform_indices = @transform_2, window_bounds = array<i64: 1, 1, 1>}]} {
    %c0 = arith.constant 0 : index
    %c0_0 = arith.constant 0 : index
    %0 = vector.load %arg1[%c0, %c0_0] : memref<16x32xf32, #tpu.memory_space<vmem>>, vector<16x32xf32>
    %c0_1 = arith.constant 0 : index
    %c0_2 = arith.constant 0 : index
    %1 = vector.load %arg2[%c0_1, %c0_2] : memref<16x1xi32, #tpu.memory_space<vmem>>, vector<16x1xi32>
    %2 = tpu.iota {dimensions = array<i32: 1>} : vector<16x32xi32>
    %c0_i32 = arith.constant 0 : i32
    %3 = vector.broadcast %c0_i32 : i32 to vector<16x1xi32>
    %4 = arith.cmpi ne, %1, %3 : vector<16x1xi32>
    %c0_i32_3 = arith.constant 0 : i32
    %5 = vector.broadcast %c0_i32_3 : i32 to vector<16x32xi32>
    %6 = arith.cmpi ne, %2, %5 : vector<16x32xi32>
    %7 = vector.broadcast %4 : vector<16x1xi1> to vector<16x32xi1>
    %8 = arith.andi %7, %6 : vector<16x32xi1>
    %9 = vector.broadcast %1 : vector<16x1xi32> to vector<16x32xi32>
    %10 = arith.cmpi eq, %2, %9 : vector<16x32xi32>
    %cst = arith.constant 0.899999976 : f32
    %cst_4 = arith.constant 0.00333333341 : f32
    %11 = vector.broadcast %cst : f32 to vector<16x32xf32>
    %12 = vector.broadcast %cst_4 : f32 to vector<16x32xf32>
    %13 = arith.select %10, %11, %12 : vector<16x32xi1>, vector<16x32xf32>
    %14 = arith.mulf %13, %0 : vector<16x32xf32>
    %cst_5 = arith.constant 0.000000e+00 : f32
    %15 = vector.broadcast %cst_5 : f32 to vector<16x32xf32>
    %16 = arith.select %8, %14, %15 : vector<16x32xi1>, vector<16x32xf32>
    %17 = arith.extui %4 : vector<16x1xi1> to vector<16x1xi32>
    %18 = arith.sitofp %17 : vector<16x1xi32> to vector<16x1xf32>
    %19 = vector.shape_cast %18 : vector<16x1xf32> to vector<1x16x1xf32>
    %cst_6 = arith.constant dense<0.000000e+00> : vector<1xf32>
    %20 = vector.multi_reduction <add>, %19, %cst_6 [1, 2] : vector<1x16x1xf32> to vector<1xf32>
    %21 = vector.shape_cast %20 : vector<1xf32> to vector<1x1x1xf32>
    %22 = vector.extract %21[0, 0, 0] : f32 from vector<1x1x1xf32>
    %cst_7 = arith.constant -0.665202737 : f32
    %23 = arith.mulf %22, %cst_7 : f32
    %24 = vector.shape_cast %16 : vector<16x32xf32> to vector<1x16x32xf32>
    %cst_8 = arith.constant dense<0.000000e+00> : vector<1xf32>
    %25 = vector.multi_reduction <add>, %24, %cst_8 [1, 2] : vector<1x16x32xf32> to vector<1xf32>
    %26 = vector.shape_cast %25 : vector<1xf32> to vector<1x1x1xf32>
    %27 = vector.extract %26[0, 0, 0] : f32 from vector<1x1x1xf32>
    %28 = arith.subf %23, %27 : f32
    %29 = vector.broadcast %28 : f32 to vector<1x1x1xf32>
    %c0_9 = arith.constant 0 : index
    %c0_10 = arith.constant 0 : index
    %c0_11 = arith.constant 0 : index
    %30 = vector.load %arg3[%c0_9, %c0_10, %c0_11] : memref<1x1x1xf32, #tpu.memory_space<vmem>>, vector<1x1x1xf32>
    tpu.vector_store %arg3[%c0_9, %c0_10, %c0_11], %29 {strides = array<i32>} : memref<1x1x1xf32, #tpu.memory_space<vmem>>, vector<1x1x1xf32>,
    return
  }
  func.func @transform_0(%arg0: i32) -> (i32, i32) {
    %c0_i32 = arith.constant 0 : i32
    %c0_i32_0 = arith.constant 0 : i32
    return %arg0, %c0_i32 : i32, i32
  }
  func.func @transform_1(%arg0: i32) -> (i32, i32) {
    %c0_i32 = arith.constant 0 : i32
    %c0_i32_0 = arith.constant 0 : i32
    return %arg0, %c0_i32 : i32, i32
  }
  func.func @transform_2(%arg0: i32) -> (i32, i32, i32) {
    %c0_i32 = arith.constant 0 : i32
    %c0_i32_0 = arith.constant 0 : i32
    %c0_i32_1 = arith.constant 0 : i32
    return %arg0, %c0_i32, %c0_i32_0 : i32, i32, i32
  }
}

</mosaic_0001>

<bundles_post_ra>
// kernel: tpu_custom_call.1
= control target key start
LH: loop header
LB: loop body
LE: loop exit
PB: predicated region body
PF: predicated region fallthrough
CT: control target
= control target key end

     0   :  { %s367_s9 = smov 0   ;;  %s394_s0 = inlined_call_operand.vmem [shape: f32[19,32], index: 0, kind: input, shape index: {}]   ;;  %s395_s1 = inlined_call_operand.vmem [shape: s32[32,1], index: 1, kind: input, shape index: {}]   ;;  %s396_s2 = inlined_call_operand.vmem [shape: f32[2,1,1], index: 2, kind: output, shape index: {}]  }
   0x1 LB: > { %s373_s10 = sadd.s32 4294967295, %s347_s9   ;;  %p315_p0 = scmp.ge.s32.totalorder %s347_s9, 1  ;;  %s347_s9 = sphi %s367_s9, %s12_s9  }
   0x2   : > { %p132_p1 = scmp.lt.s32.totalorder %s347_s9, 3 }
   0x4   : > { %p133_p2 = pnand %p315_p0, %p132_p1 }
   0x5   : > { %s316_s11 = sshll.u32 (!%p133_p2), %s373_s10, 1  ;;  %v349_v0 = vmov (!%p133_p2), 0   ;;  %v350_v5 = vmov (!%p133_p2), 0.0   ;;  %vm221_vm2 = vcmask (!%p133_p2), 7168   ;;  %v188_v11 = vlaneseq (!%p133_p2)  ;;  %p181_p5 = scmp.lt.s32.totalorder (!%p133_p2), %s373_s10, 1 }
   0x6   : > { %136 = sbr.rel (%p133_p2) target bundleno = 366 (0x16e), region = 28  ;;  %339 = vset.pattern.permute.xlu0 (!%p133_p2), %v349_v0  ;;  %p176_p3 = scmp.lt.s32.totalorder (!%p133_p2), %s316_s11, 3  ;;  %340 = vset.pattern.permute.xlu1 (!%p133_p2), %v349_v0  ;;  %v351_v15 = vmov (!%p133_p2), 0.0033333334   ;;  %vm235_vm9 = vcmask (!%p133_p2), 261120   ;;  %vm250_vm11 = vcmask (!%p133_p2), 0  }
   0x7   : > { %p166_p4 = scmp.lt.s32.totalorder (!%p133_p2), %s316_s11, 2  ;;  %v189_v12 = vand.u32 (!%p133_p2), 127, %v188_v11 }
   0x9   : > { %vm192_vm4 = vcmp.ne.s32.totalorder (!%p133_p2), %v189_v12, 0 }
   0xd   : > { %s177_s12 = scalar_select %p176_p3, %s316_s11, 3 }
   0xe   : > { %s398_s11 = smov (!%p166_p4, %s316_s11), 2  ;;  %s400_s10 = smov (!%p181_p5, %s373_s10), 1 }
   0xf   : > { %s319_s13 = sshll.u32 %s177_s12, 3  ;;  %s317_s17 = sshll.u32 %s398_s11, 3 }
  0x10   : > { %s179_s16 = scalar_lea.vmem %s395_s1, %s319_s13  ;;  %s169_s20 = scalar_lea.vmem %s394_s0, %s317_s17 }
  0x11   : > { %v186_v1 = vld [vmem:[%s179_s16] sm:$0xff]  ;;  %v187_v2 = vld [vmem:[%s179_s16 + $0x8] sm:$0xff]  ;;  %s183_s26 = scalar_lea.vmem %s396_s2, %s400_s10 }
  0x12   : > { %206 = vperm.xlu0 %339, %v186_v1   ;;  %vm190_vm0 = vcmp.ne.s32.totalorder %v186_v1, 0  ;;  %vm191_vm1 = vcmp.ne.s32.totalorder %v187_v2, 0  ;;  %v184_v14 = vld [vmem:[%s169_s20] sm:$0xff]  ;;  %v185_v20 = vld [vmem:[%s169_s20 + $0x8] sm:$0xff] }
  0x13   : > { %v193_v3 = vsel %vm190_vm0, 1, %v349_v0  ;;  %v194_v4 = vsel %vm191_vm1, 1, %v349_v0  ;;  %v320_v6 = vsel %vm190_vm0, 1.0, %v350_v5  ;;  %v321_v7 = vsel %vm191_vm1, 1.0, %v350_v5 }
  0x14   : > { %196 = vperm.xlu1 %340, %v193_v3   ;;  %v222_v8 = vsel %vm221_vm2, %v320_v6, 0.0  ;;  %v223_v9 = vsel %vm221_vm2, %v321_v7, 0.0 }
  0x15   : > { %v224_v10 = vadd.f32 %v223_v9, %v222_v8 }
  0x16   : > { %209 = vperm.xlu0 %339, %v187_v2  }
  0x18   : > { %199 = vperm.xlu1 %340, %v194_v4  }
  0x35   : > { %225 = vadd.xlane.f32.xlu0 %v224_v10 }
  0x91   : > { %v207_v13 = vpop.permute.xlu0 %206 }
  0x92   : > { %vm211_vm3 = vcmp.eq.s32.totalorder %v189_v12, %v207_v13 }
  0x93   : > { %v213_v16 = vsel %vm211_vm3, 0.9, %v351_v15  ;;  %v197_v17 = vpop.permute.xlu1 %196 }
  0x94   : > { %v215_v18 = vmul.f32 %v213_v16, %v184_v14  ;;  %vm201_vm5 = vcmp.eq.s32.totalorder %v197_v17, 1 }
  0x95   : > { %vm203_vm6 = vmand %vm201_vm5, %vm192_vm4  ;;  %v210_v19 = vpop.permute.xlu0 %209 }
  0x96   : > { %vm212_vm7 = vcmp.eq.s32.totalorder %v189_v12, %v210_v19  ;;  %v217_v23 = vsel %vm203_vm6, %v215_v18, 0.0 }
  0x97   : > { %v214_v21 = vsel %vm212_vm7, 0.9, %v351_v15  ;;  %v200_v22 = vpop.permute.xlu1 %199  ;;  %v236_v26 = vsel %vm235_vm9, %v217_v23, 0.0 }
  0x98   : > { %v216_v24 = vmul.f32 %v214_v21, %v185_v20  ;;  %vm202_vm8 = vcmp.eq.s32.totalorder %v200_v22, 1 }
  0x99   : > { %vm204_vm10 = vmand %vm202_vm8, %vm192_vm4 }
  0x9a   : > { %v218_v25 = vsel %vm204_vm10, %v216_v24, 0.0 }
  0x9b   : > { %v237_v27 = vsel %vm235_vm9, %v218_v25, 0.0 }
  0x9c   : > { %v238_v28 = vadd.f32 %v237_v27, %v236_v26 }
  0x9e   : > { %239 = vadd.xlane.f32.xlu1 %v238_v28 }
  0xc2   : > { %v226_v29 = vpop.xlane.xlu0 %225 }
  0xc3   : > { %v227_v30 = vrot.slane %v226_v29, 4 }
  0xc5   : > { %v228_v31 = vadd.f32 %v227_v30, %v226_v29 }
  0xc7   : > { %v229_v32 = vrot.slane %v228_v31, 2 }
  0xc9   : > { %v230_v33 = vadd.f32 %v229_v32, %v228_v31 }
  0xcb   : > { %v231_v34 = vrot.slane %v230_v33, 1 }
  0xcd   : > { %v232_v35 = vadd.f32 %v231_v34, %v230_v33 }
  0xcf   : > { %324 = vpush %v232_v35 }
 0x100   : > { %s325_s21 = spop %324 }
 0x101   : > { %s234_s22 = smul.f32 -0.66520274, %s325_s21 }
 0x12b   : > { %v240_v36 = vpop.xlane.xlu1 %239 }
 0x12c   : > { %v241_v37 = vrot.slane %v240_v36, 4 }
 0x12e   : > { %v242_v38 = vadd.f32 %v241_v37, %v240_v36 }
 0x130   : > { %v243_v39 = vrot.slane %v242_v38, 2 }
 0x132   : > { %v244_v40 = vadd.f32 %v243_v39, %v242_v38 }
 0x134   : > { %v245_v41 = vrot.slane %v244_v40, 1 }
 0x136   : > { %v246_v42 = vadd.f32 %v245_v41, %v244_v40 }
 0x138   : > { %326 = vpush %v246_v42 }
 0x169   : > { %s327_s23 = spop %326 }
 0x16a   : > { %s248_s27 = ssub.f32 %s234_s22, %s327_s23 }
 0x16c   : > { %v249_v43 = vstv %s248_s27 }
 0x16d   : > { %251 = vst.msk [vmem:[%s183_s26] sm:$0x1] %vm250_vm11, %v249_v43 }
 0x16e PF: > { %s12_s9 = sadd.s32 1, %s347_s9  }
 0x16f   : > { %p9_p6 = scmp.ge.s32.totalorder %s12_s9, 4  }
 0x171   :  { %11 = sbr.rel (!%p9_p6) target bundleno = 1 (0x1), region = 61 }

</bundles_post_ra>
